<compile_context>
chip_gen: v5e
topology: v5e:2x2
jax: 0.10.0
libtpu: 0.0.40
codegen_flags: <defaults>
</compile_context>

<pallas_src>
import jax
import jax.numpy as jnp
from jax.experimental import pallas as pl
from jax.experimental.pallas import tpu as pltpu

BN_EPS = 1e-5
VMEM_LIMIT = 32 * 1024 * 1024  # fits v7x's smaller (64 MiB physical) VMEM too


def _pick_tile(hw):
    for cand in (512, 256, 128):
        if hw % cand == 0:
            return cand
    return hw  # full extent (legal: block dim equals full array dim)


def stats_kernel(x_ref, w_ref, sum_ref, sumsq_ref):
    # x_ref: (1, Cin, T), w_ref: (Cout, Cin), sum/sumsq: (Cout, 1) accumulators
    @pl.when((pl.program_id(0) == 0) & (pl.program_id(1) == 0))
    def _():
        sum_ref[...] = jnp.zeros_like(sum_ref)
        sumsq_ref[...] = jnp.zeros_like(sumsq_ref)

    x = x_ref[0]                                                   # (Cin, T)
    y = jnp.dot(w_ref[...], x, preferred_element_type=jnp.float32)  # (Cout, T)
    sum_ref[...] += jnp.sum(y, axis=1, keepdims=True)
    sumsq_ref[...] += jnp.sum(y * y, axis=1, keepdims=True)


def norm_kernel(x_ref, w_ref, scale_ref, shift_ref, o_ref):
    # x_ref: (1, Cin, T), w_ref: (Cout, Cin), scale/shift: (Cout, 1), o_ref: (1, Cout, T)
    x = x_ref[0]                                                   # (Cin, T)
    y = jnp.dot(w_ref[...], x, preferred_element_type=jnp.float32)  # (Cout, T)
    z = y * scale_ref[...] + shift_ref[...]                        # fused BN FMA
    # sigmoid: exp on EUP, exact reciprocal
    o_ref[0] = pl.reciprocal(1.0 + jnp.exp(-z)).astype(o_ref.dtype)


def conv1l_forward(x_nchw, weight, bias, gamma, beta):
    """x_nchw: (N, Cin, H, W); weight: (Cout, Cin) [or (Cout, Cin, 1, 1)];
    bias/gamma/beta: (Cout,).  Train-mode BN (batch stats) + sigmoid."""
    del bias  # exactly cancelled by BatchNorm's mean subtraction (train mode)
    N, Cin, H, W = x_nchw.shape
    Cout = weight.shape[0]
    HW = H * W
    M = N * HW
    T = _pick_tile(HW)
    n_t = HW // T

    x3 = x_nchw.reshape(N, Cin, HW).astype(jnp.float32)   # contiguous, free reshape
    w = weight.reshape(Cout, Cin).astype(jnp.float32)

    # ---- pass 1: global per-channel sum / sum-of-squares of y = W @ x ----
    ssum, ssq = pl.pallas_call(
        stats_kernel,
        out_shape=(
            jax.ShapeDtypeStruct((Cout, 1), jnp.float32),
            jax.ShapeDtypeStruct((Cout, 1), jnp.float32),
        ),
        grid=(N, n_t),
        in_specs=[
            pl.BlockSpec((1, Cin, T), lambda n, t: (n, 0, t)),
            pl.BlockSpec((Cout, Cin), lambda n, t: (0, 0)),
        ],
        out_specs=(
            pl.BlockSpec((Cout, 1), lambda n, t: (0, 0)),
            pl.BlockSpec((Cout, 1), lambda n, t: (0, 0)),
        ),
        compiler_params=pltpu.CompilerParams(
            dimension_semantics=("arbitrary", "arbitrary"),
            vmem_limit_bytes=VMEM_LIMIT,
        ),
        cost_estimate=pl.CostEstimate(
            flops=2 * M * Cin * Cout + 3 * M * Cout,
            transcendentals=0,
            bytes_accessed=4 * (M * Cin + Cin * Cout + 2 * Cout),
        ),
    )(x3, w)

    # tiny per-channel math (Cout elements) -> fused BN scale/shift
    mean = ssum / M
    var = jnp.maximum(ssq / M - mean * mean, 0.0)
    inv_std = jax.lax.rsqrt(var + BN_EPS)
    scale = gamma.reshape(Cout, 1).astype(jnp.float32) * inv_std
    shift = beta.reshape(Cout, 1).astype(jnp.float32) - mean * scale

    # ---- pass 2: y = W @ x, z = y*scale + shift, sigmoid, lane-dense store ----
    out3 = pl.pallas_call(
        norm_kernel,
        out_shape=jax.ShapeDtypeStruct((N, Cout, HW), jnp.float32),
        grid=(N, n_t),
        in_specs=[
            pl.BlockSpec((1, Cin, T), lambda n, t: (n, 0, t)),
            pl.BlockSpec((Cout, Cin), lambda n, t: (0, 0)),
            pl.BlockSpec((Cout, 1), lambda n, t: (0, 0)),
            pl.BlockSpec((Cout, 1), lambda n, t: (0, 0)),
        ],
        out_specs=pl.BlockSpec((1, Cout, T), lambda n, t: (n, 0, t)),
        compiler_params=pltpu.CompilerParams(
            dimension_semantics=("parallel", "parallel"),
            vmem_limit_bytes=VMEM_LIMIT,
        ),
        cost_estimate=pl.CostEstimate(
            flops=2 * M * Cin * Cout + 4 * M * Cout,
            transcendentals=M * Cout,
            bytes_accessed=4 * (M * Cin + M * Cout + Cin * Cout + 2 * Cout),
        ),
    )(x3, w, scale, shift)

    return out3.reshape(N, Cout, H, W)   # free reshape back to NCHW


def conv1l_reference(x_nchw, weight, bias, gamma, beta):
    """Plain-JAX reference mirroring PyTorch conv1L forward (train-mode BN)."""
    N, Cin, H, W = x_nchw.shape
    Cout = weight.shape[0]
    x_flat = jnp.transpose(x_nchw, (0, 2, 3, 1)).reshape(-1, Cin)
    y = x_flat @ weight.reshape(Cout, Cin).T + bias
    mean = jnp.mean(y, axis=0, keepdims=True)
    var = jnp.mean((y - mean) ** 2, axis=0, keepdims=True)
    z = (y - mean) / jnp.sqrt(var + BN_EPS) * gamma + beta
    out = jax.nn.sigmoid(z)
    return jnp.transpose(out.reshape(N, H, W, Cout), (0, 3, 1, 2))


if __name__ == "__main__":
    # Small shapes consistent with the module: dim_in=4, dim_out=8, kernel=1.
    N, Cin, Cout, H, W = 2, 4, 8, 16, 16

    key = jax.random.PRNGKey(0)
    kx, kw, kb, kg, kbe = jax.random.split(key, 5)

    x = jax.random.normal(kx, (N, Cin, H, W), dtype=jnp.float32)
    # Conv2d(dim_in, dim_out, kernel=1) weight is (Cout, Cin, 1, 1); store as (Cout, Cin).
    weight = jax.random.normal(kw, (Cout, Cin), dtype=jnp.float32) * 0.1
    bias = jax.random.normal(kb, (Cout,), dtype=jnp.float32) * 0.1
    # BatchNorm2d affine params (default init gamma=1, beta=0; perturb for a nontrivial test).
    gamma = 1.0 + 0.1 * jax.random.normal(kg, (Cout,), dtype=jnp.float32)
    beta = 0.1 * jax.random.normal(kbe, (Cout,), dtype=jnp.float32)

    out = jax.jit(conv1l_forward)(x, weight, bias, gamma, beta)
    out = jax.block_until_ready(out)

    ref = conv1l_reference(x, weight, bias, gamma, beta)
    assert out.shape == (N, Cout, H, W), out.shape
    assert jnp.allclose(out, ref, atol=1e-5, rtol=1e-5), float(jnp.max(jnp.abs(out - ref)))

    print("KERNEL_OK")
</pallas_src>

<mosaic_0001>
module attributes {stable_mosaic.version = 11 : i64} {
  func.func @stats_kernel(%arg0: i32, %arg1: i32, %arg2: memref<1x4x256xf32, #tpu.memory_space<vmem>>, %arg3: memref<8x4xf32, #tpu.memory_space<vmem>>, %arg4: memref<8x1xf32, #tpu.memory_space<vmem>>, %arg5: memref<8x1xf32, #tpu.memory_space<vmem>>) attributes {dimension_semantics = [#tpu.dimension_semantics<arbitrary>, #tpu.dimension_semantics<arbitrary>], iteration_bounds = array<i64: 2, 1>, scalar_prefetch = 0 : i64, scratch_operands = 0 : i64, tpu.core_type = #tpu.core_type<tc>, window_params = [{transform_indices = @transform_0, window_bounds = array<i64: 1, 4, 256>}, {pipeline_mode = #tpu.pipeline_mode<synchronous>, transform_indices = @transform_1, window_bounds = array<i64: 8, 4>}, {pipeline_mode = #tpu.pipeline_mode<synchronous>, transform_indices = @transform_2, window_bounds = array<i64: 8, 1>}, {pipeline_mode = #tpu.pipeline_mode<synchronous>, transform_indices = @transform_3, window_bounds = array<i64: 8, 1>}]} {
    %c0_i32 = arith.constant 0 : i32
    %0 = arith.cmpi eq, %arg0, %c0_i32 : i32
    %c0_i32_0 = arith.constant 0 : i32
    %1 = arith.cmpi eq, %arg1, %c0_i32_0 : i32
    %2 = arith.andi %0, %1 : i1
    %3 = arith.extui %2 : i1 to i32
    %c0_i32_1 = arith.constant 0 : i32
    %4 = arith.cmpi ne, %3, %c0_i32_1 : i32
    scf.if %4 {
      %cst_16 = arith.constant 0.000000e+00 : f32
      %20 = vector.broadcast %cst_16 : f32 to vector<8x1xf32>
      %c0_17 = arith.constant 0 : index
      %c0_18 = arith.constant 0 : index
      %21 = vector.load %arg4[%c0_17, %c0_18] : memref<8x1xf32, #tpu.memory_space<vmem>>, vector<8x1xf32>
      tpu.vector_store %arg4[%c0_17, %c0_18], %20 {strides = array<i32>} : memref<8x1xf32, #tpu.memory_space<vmem>>, vector<8x1xf32>,
      %cst_19 = arith.constant 0.000000e+00 : f32
      %22 = vector.broadcast %cst_19 : f32 to vector<8x1xf32>
      %c0_20 = arith.constant 0 : index
      %c0_21 = arith.constant 0 : index
      %23 = vector.load %arg5[%c0_20, %c0_21] : memref<8x1xf32, #tpu.memory_space<vmem>>, vector<8x1xf32>
      tpu.vector_store %arg5[%c0_20, %c0_21], %22 {strides = array<i32>} : memref<8x1xf32, #tpu.memory_space<vmem>>, vector<8x1xf32>,
    } else {
    }
    %c0 = arith.constant 0 : index
    %c0_2 = arith.constant 0 : index
    %c0_3 = arith.constant 0 : index
    %5 = vector.load %arg2[%c0, %c0_2, %c0_3] : memref<1x4x256xf32, #tpu.memory_space<vmem>>, vector<1x4x256xf32>
    %6 = vector.shape_cast %5 : vector<1x4x256xf32> to vector<4x256xf32>
    %c0_4 = arith.constant 0 : index
    %c0_5 = arith.constant 0 : index
    %7 = vector.load %arg3[%c0_4, %c0_5] : memref<8x4xf32, #tpu.memory_space<vmem>>, vector<8x4xf32>
    %cst = arith.constant dense<0.000000e+00> : vector<8x256xf32>
    %8 = tpu.matmul %7, %6, %cst {dimension_numbers = #tpu.dot_dimension_numbers<[1], [0], [0], [1], [0, 0, 1, 1], [], []>} : vector<8x4xf32>, vector<4x256xf32>, vector<8x256xf32> -> vector<8x256xf32>
    %c0_6 = arith.constant 0 : index
    %c0_7 = arith.constant 0 : index
    %9 = vector.load %arg4[%c0_6, %c0_7] : memref<8x1xf32, #tpu.memory_space<vmem>>, vector<8x1xf32>
    %cst_8 = arith.constant dense<0.000000e+00> : vector<8xf32>
    %10 = vector.multi_reduction <add>, %8, %cst_8 [1] : vector<8x256xf32> to vector<8xf32>
    %11 = vector.shape_cast %10 : vector<8xf32> to vector<8x1xf32>
    %12 = arith.addf %9, %11 : vector<8x1xf32>
    %c0_9 = arith.constant 0 : index
    %c0_10 = arith.constant 0 : index
    %13 = vector.load %arg4[%c0_9, %c0_10] : memref<8x1xf32, #tpu.memory_space<vmem>>, vector<8x1xf32>
    tpu.vector_store %arg4[%c0_9, %c0_10], %12 {strides = array<i32>} : memref<8x1xf32, #tpu.memory_space<vmem>>, vector<8x1xf32>,
    %c0_11 = arith.constant 0 : index
    %c0_12 = arith.constant 0 : index
    %14 = vector.load %arg5[%c0_11, %c0_12] : memref<8x1xf32, #tpu.memory_space<vmem>>, vector<8x1xf32>
    %15 = arith.mulf %8, %8 : vector<8x256xf32>
    %cst_13 = arith.constant dense<0.000000e+00> : vector<8xf32>
    %16 = vector.multi_reduction <add>, %15, %cst_13 [1] : vector<8x256xf32> to vector<8xf32>
    %17 = vector.shape_cast %16 : vector<8xf32> to vector<8x1xf32>
    %18 = arith.addf %14, %17 : vector<8x1xf32>
    %c0_14 = arith.constant 0 : index
    %c0_15 = arith.constant 0 : index
    %19 = vector.load %arg5[%c0_14, %c0_15] : memref<8x1xf32, #tpu.memory_space<vmem>>, vector<8x1xf32>
    tpu.vector_store %arg5[%c0_14, %c0_15], %18 {strides = array<i32>} : memref<8x1xf32, #tpu.memory_space<vmem>>, vector<8x1xf32>,
    return
  }
  func.func @transform_0(%arg0: i32, %arg1: i32) -> (i32, i32, i32) {
    %c0_i32 = arith.constant 0 : i32
    %c0_i32_0 = arith.constant 0 : i32
    return %arg0, %c0_i32, %arg1 : i32, i32, i32
  }
  func.func @transform_1(%arg0: i32, %arg1: i32) -> (i32, i32) {
    %c0_i32 = arith.constant 0 : i32
    %c0_i32_0 = arith.constant 0 : i32
    %c0_i32_1 = arith.constant 0 : i32
    return %c0_i32, %c0_i32_0 : i32, i32
  }
  func.func @transform_2(%arg0: i32, %arg1: i32) -> (i32, i32) {
    %c0_i32 = arith.constant 0 : i32
    %c0_i32_0 = arith.constant 0 : i32
    %c0_i32_1 = arith.constant 0 : i32
    return %c0_i32, %c0_i32_0 : i32, i32
  }
  func.func @transform_3(%arg0: i32, %arg1: i32) -> (i32, i32) {
    %c0_i32 = arith.constant 0 : i32
    %c0_i32_0 = arith.constant 0 : i32
    %c0_i32_1 = arith.constant 0 : i32
    return %c0_i32, %c0_i32_0 : i32, i32
  }
}

module attributes {stable_mosaic.version = 11 : i64} {
  func.func @norm_kernel(%arg0: i32, %arg1: i32, %arg2: memref<1x4x256xf32, #tpu.memory_space<vmem>>, %arg3: memref<8x4xf32, #tpu.memory_space<vmem>>, %arg4: memref<8x1xf32, #tpu.memory_space<vmem>>, %arg5: memref<8x1xf32, #tpu.memory_space<vmem>>, %arg6: memref<1x8x256xf32, #tpu.memory_space<vmem>>) attributes {dimension_semantics = [#tpu.dimension_semantics<parallel>, #tpu.dimension_semantics<parallel>], iteration_bounds = array<i64: 2, 1>, scalar_prefetch = 0 : i64, scratch_operands = 0 : i64, tpu.core_type = #tpu.core_type<tc>, window_params = [{transform_indices = @transform_0, window_bounds = array<i64: 1, 4, 256>}, {pipeline_mode = #tpu.pipeline_mode<synchronous>, transform_indices = @transform_1, window_bounds = array<i64: 8, 4>}, {pipeline_mode = #tpu.pipeline_mode<synchronous>, transform_indices = @transform_2, window_bounds = array<i64: 8, 1>}, {pipeline_mode = #tpu.pipeline_mode<synchronous>, transform_indices = @transform_3, window_bounds = array<i64: 8, 1>}, {transform_indices = @transform_4, window_bounds = array<i64: 1, 8, 256>}]} {
    %c0 = arith.constant 0 : index
    %c0_0 = arith.constant 0 : index
    %c0_1 = arith.constant 0 : index
    %0 = vector.load %arg2[%c0, %c0_0, %c0_1] : memref<1x4x256xf32, #tpu.memory_space<vmem>>, vector<1x4x256xf32>
    %1 = vector.shape_cast %0 : vector<1x4x256xf32> to vector<4x256xf32>
    %c0_2 = arith.constant 0 : index
    %c0_3 = arith.constant 0 : index
    %2 = vector.load %arg3[%c0_2, %c0_3] : memref<8x4xf32, #tpu.memory_space<vmem>>, vector<8x4xf32>
    %cst = arith.constant dense<0.000000e+00> : vector<8x256xf32>
    %3 = tpu.matmul %2, %1, %cst {dimension_numbers = #tpu.dot_dimension_numbers<[1], [0], [0], [1], [0, 0, 1, 1], [], []>} : vector<8x4xf32>, vector<4x256xf32>, vector<8x256xf32> -> vector<8x256xf32>
    %c0_4 = arith.constant 0 : index
    %c0_5 = arith.constant 0 : index
    %4 = vector.load %arg4[%c0_4, %c0_5] : memref<8x1xf32, #tpu.memory_space<vmem>>, vector<8x1xf32>
    %5 = vector.broadcast %4 : vector<8x1xf32> to vector<8x256xf32>
    %6 = arith.mulf %3, %5 : vector<8x256xf32>
    %c0_6 = arith.constant 0 : index
    %c0_7 = arith.constant 0 : index
    %7 = vector.load %arg5[%c0_6, %c0_7] : memref<8x1xf32, #tpu.memory_space<vmem>>, vector<8x1xf32>
    %8 = vector.broadcast %7 : vector<8x1xf32> to vector<8x256xf32>
    %9 = arith.addf %6, %8 : vector<8x256xf32>
    %cst_8 = arith.constant 0.000000e+00 : f32
    %10 = vector.broadcast %cst_8 : f32 to vector<8x256xf32>
    %11 = arith.subf %10, %9 : vector<8x256xf32>
    %12 = math.exp %11 : vector<8x256xf32>
    %cst_9 = arith.constant 1.000000e+00 : f32
    %13 = vector.broadcast %cst_9 : f32 to vector<8x256xf32>
    %14 = arith.addf %13, %12 : vector<8x256xf32>
    %15 = tpu.reciprocal %14 : vector<8x256xf32> -> vector<8x256xf32>
    %c0_10 = arith.constant 0 : index
    %c0_11 = arith.constant 0 : index
    %c0_12 = arith.constant 0 : index
    %16 = vector.load %arg6[%c0_10, %c0_11, %c0_12] : memref<1x8x256xf32, #tpu.memory_space<vmem>>, vector<1x8x256xf32>
    %17 = vector.shape_cast %16 : vector<1x8x256xf32> to vector<8x256xf32>
    %18 = vector.shape_cast %15 : vector<8x256xf32> to vector<1x8x256xf32>
    tpu.vector_store %arg6[%c0_10, %c0_11, %c0_12], %18 {strides = array<i32>} : memref<1x8x256xf32, #tpu.memory_space<vmem>>, vector<1x8x256xf32>,
    return
  }
  func.func @transform_0(%arg0: i32, %arg1: i32) -> (i32, i32, i32) {
    %c0_i32 = arith.constant 0 : i32
    %c0_i32_0 = arith.constant 0 : i32
    return %arg0, %c0_i32, %arg1 : i32, i32, i32
  }
  func.func @transform_1(%arg0: i32, %arg1: i32) -> (i32, i32) {
    %c0_i32 = arith.constant 0 : i32
    %c0_i32_0 = arith.constant 0 : i32
    %c0_i32_1 = arith.constant 0 : i32
    return %c0_i32, %c0_i32_0 : i32, i32
  }
  func.func @transform_2(%arg0: i32, %arg1: i32) -> (i32, i32) {
    %c0_i32 = arith.constant 0 : i32
    %c0_i32_0 = arith.constant 0 : i32
    %c0_i32_1 = arith.constant 0 : i32
    return %c0_i32, %c0_i32_0 : i32, i32
  }
  func.func @transform_3(%arg0: i32, %arg1: i32) -> (i32, i32) {
    %c0_i32 = arith.constant 0 : i32
    %c0_i32_0 = arith.constant 0 : i32
    %c0_i32_1 = arith.constant 0 : i32
    return %c0_i32, %c0_i32_0 : i32, i32
  }
  func.func @transform_4(%arg0: i32, %arg1: i32) -> (i32, i32, i32) {
    %c0_i32 = arith.constant 0 : i32
    %c0_i32_0 = arith.constant 0 : i32
    return %arg0, %c0_i32, %arg1 : i32, i32, i32
  }
}

</mosaic_0001>

<bundles_post_ra>
// kernel: conv1l_forward.2
= control target key start
LH: loop header
LB: loop body
LE: loop exit
PB: predicated region body
PF: predicated region fallthrough
CT: control target
= control target key end

     0   :  { %s394_s12 = smov 0   ;;  %s396_s13 = smov 0   ;;  %s445_s0 = inlined_call_operand.vmem [shape: f32[2,4,256], index: 0, kind: input, shape index: {}]   ;;  %s446_s1 = inlined_call_operand.vmem [shape: f32[8,4], index: 1, kind: input, shape index: {}]   ;;  %s447_s2 = inlined_call_operand.vmem [shape: f32[8,1], index: 2, kind: output, shape index: {0}]   ;;  %s448_s3 = inlined_call_operand.vmem [shape: f32[8,1], index: 3, kind: output, shape index: {1}]  }
   0x1   :  { %s398_s14 = smov 0  }
   0x2 LB: > { %s26_s15 = sadd.s32 1, %s367_s13  ;;  %p312_p0 = scmp.ge.s32.totalorder %s371_s14, 1  ;;  %s371_s14 = sphi %s398_s14, %s14_s14   ;;  %s367_s13 = sphi %s396_s13, %s450_s13   ;;  %s363_s12 = sphi %s394_s12, %s449_s12  }
   0x3   : > { %p28_p1 = scmp.ge.s32.totalorder %s26_s15, 2  ;;  %p149_p2 = scmp.lt.s32.totalorder %s371_s14, 3 }
   0x5   : > { %s452_s15 = smov (%p28_p1, %s26_s15), 0  ;;  %p150_p3 = pnand %p312_p0, %p149_p2 }
   0x6   : > { %p173_p4 = scmp.lt.s32.totalorder (!%p150_p3), %s363_s12, 1  ;;  %p182_p5 = scmp.eq.s32.totalorder (!%p150_p3), %s363_s12, 0 }
   0x7   : > { %153 = sbr.rel (%p150_p3) target bundleno = 282 (0x11a), region = 28 }
   0xc   : > { %s454_s12 = smov (!%p173_p4, %s363_s12), 1  ;;  %187 = sbr.rel (!%p182_p5) target bundleno = 17 (0x11), region = 32  ;;  %vm188_vm0 = vcmask (%p182_p5), 7168   ;;  %v373_v0 = vmov (%p182_p5), 0.0  }
   0xd   : > { %s322_s16 = sshll.u32 %s454_s12, 3  ;;  %189 = vst.msk [vmem:[%s447_s2] sm:$0xff] (%p182_p5), %vm188_vm0, %v373_v0 }
   0xe   : > { %s180_s19 = scalar_lea.vmem %s445_s0, %s322_s16  ;;  %190 = vst.msk [vmem:[%s448_s3] sm:$0xff] (%p182_p5), %vm188_vm0, %v373_v0 }
  0x11 PF: > { %v191_v1 = vld [vmem:[%s180_s19] sm:$0xff]  ;;  %vm201_vm1 = vcmask 1043456   ;;  %vm197_vm2 = vcmask 31744   ;;  %vm251_vm3 = vcmask 7168  }
  0x12   : > { %194 = vst [vmem:[#allocation1] ss:$2 sm:$0xff] %v191_v1  ;;  %v192_v2 = vld [vmem:[%s446_s1] sm:$0xff] }
  0x14   : > { %v246_v11 = vld [vmem:[%s447_s2] sm:$0xff] }
  0x15   : > { %v253_v14 = vld [vmem:[%s448_s3] sm:$0xff] }
  0x19   : > { %v195_v3 = vld.sshfl [vmem:[#allocation1] sm:$0xff pattern:$0x75316420]  ;;  %v196_v4 = vld.sshfl [vmem:[#allocation1 + $0x8] sm:$0xff pattern:$0x75316420] }
  0x1a   : > { %316 = vmatpush.msk.msra.mxu0 %vm201_vm1, %v195_v3  ;;  %318 = vmatpush.msk.msra.mxu1 %vm201_vm1, %v196_v4 }
  0x1b   : > { %317 = vmatmul.msk.f32.vlgmr.msra.gmra.mxu0 %vm197_vm2, %v192_v2  ;;  %319 = vmatmul.msk.f32.vlgmr.msra.gmra.mxu1 %vm197_vm2, %v192_v2 }
  0x98   : > { %v223_v5 = vpop.f32.mrf.mxu0  ;;  %v243_v6 = vpop.f32.mrf.mxu1 }
  0x99   : > { %v247_v7 = vadd.f32 %v243_v6, %v223_v5  ;;  %v254_v8 = vmul.f32 %v223_v5, %v223_v5  ;;  %v255_v9 = vmul.f32 %v243_v6, %v243_v6 }
  0x9b   : > { %248 = vadd.xlane.f32.xlu0 %v247_v7  ;;  %v256_v10 = vadd.f32 %v255_v9, %v254_v8 }
  0xa3   : > { %257 = vadd.xlane.f32.xlu0 %v256_v10 }
 0x10e   : > { %v249_v12 = vpop.xlane.xlu0 %248 }
 0x10f   : > { %v250_v13 = vadd.f32 %v249_v12, %v246_v11 }
 0x111   : > { %252 = vst.msk [vmem:[%s447_s2] sm:$0xff] %vm251_vm3, %v250_v13 }
 0x116   : > { %v258_v15 = vpop.xlane.xlu0 %257 }
 0x117   : > { %v259_v16 = vadd.f32 %v258_v15, %v253_v14 }
 0x119   : > { %260 = vst.msk [vmem:[%s448_s3] sm:$0xff] %vm251_vm3, %v259_v16 }
 0x11a PF: > { %s14_s14 = sadd.s32 1, %s371_s14   ;;  %s449_s12 = smov %s367_s13 }
 0x11b   : > { %p11_p6 = scmp.ge.s32.totalorder %s14_s14, 4   ;;  %s450_s13 = smov %s452_s15 }
 0x11d   :  { %13 = sbr.rel (!%p11_p6) target bundleno = 2 (0x2), region = 66 }

// kernel: conv1l_forward.3
= control target key start
LH: loop header
LB: loop body
LE: loop exit
PB: predicated region body
PF: predicated region fallthrough
CT: control target
= control target key end

     0   :  { %s534_s15 = smov 0   ;;  %s536_s16 = smov 0   ;;  %s580_s0 = inlined_call_operand.vmem [shape: f32[2,4,256], index: 0, kind: input, shape index: {}]   ;;  %s581_s1 = inlined_call_operand.vmem [shape: f32[8,4], index: 1, kind: input, shape index: {}]   ;;  %s582_s2 = inlined_call_operand.vmem [shape: f32[8,1], index: 2, kind: input, shape index: {}]   ;;  %s583_s3 = inlined_call_operand.vmem [shape: f32[8,1], index: 3, kind: input, shape index: {}]   ;;  %s584_s4 = inlined_call_operand.vmem [shape: f32[2,8,256], index: 4, kind: output, shape index: {}]  }
   0x1   :  { %s538_s17 = smov 0  }
   0x2 LB: > { %s26_s18 = sadd.s32 1, %s502_s16  ;;  %p437_p0 = scmp.ge.s32.totalorder %s506_s17, 1  ;;  %s506_s17 = sphi %s538_s17, %s14_s17   ;;  %s502_s16 = sphi %s536_s16, %s586_s16   ;;  %s498_s15 = sphi %s534_s15, %s585_s15  }
   0x3   : > { %p28_p1 = scmp.ge.s32.totalorder %s26_s18, 2  ;;  %p183_p2 = scmp.lt.s32.totalorder %s506_s17, 3 }
   0x5   : > { %s588_s18 = smov (%p28_p1, %s26_s18), 0  ;;  %p184_p3 = pnand %p437_p0, %p183_p2 }
   0x6   : > { %p218_p4 = scmp.lt.s32.totalorder (!%p184_p3), %s498_s15, 1 }
   0x7   : > { %187 = sbr.rel (%p184_p3) target bundleno = 187 (0xbb), region = 36 }
   0xc   : > { %v292_v0 = vld [vmem:[%s582_s2] sm:$0xff]  ;;  %v508_v1 = vmov 0   ;;  %s590_s15 = smov (!%p218_p4, %s498_s15), 1  ;;  %vm247_vm0 = vcmask 1043456   ;;  %vm243_vm1 = vcmask 31744  }
   0xd   : > { %475 = vset.pattern.permute.xlu0 %v508_v1  ;;  %s448_s21 = sshll.u32 %s590_s15, 3  ;;  %v300_v3 = vld [vmem:[%s583_s3] sm:$0xff]  ;;  %s449_s29 = sshll.u32 %s590_s15, 4 }
   0xe   : > { %295 = vperm.xlu0 %475, %v292_v0   ;;  %s225_s24 = scalar_lea.vmem %s580_s0, %s448_s21  ;;  %v238_v4 = vld [vmem:[%s581_s1] sm:$0xff]  ;;  %s235_s6 = scalar_lea.vmem %s584_s4, %s449_s29 }
   0xf   : > { %v237_v2 = vld [vmem:[%s225_s24] sm:$0xff] }
  0x10   : > { %240 = vst [vmem:[#allocation1] ss:$2 sm:$0xff] %v237_v2 }
  0x16   : > { %303 = vperm.xlu0 %475, %v300_v3  }
  0x17   : > { %v241_v5 = vld.sshfl [vmem:[#allocation1] sm:$0xff pattern:$0x75316420]  ;;  %v242_v6 = vld.sshfl [vmem:[#allocation1 + $0x8] sm:$0xff pattern:$0x75316420] }
  0x18   : > { %442 = vmatpush.msk.msra.mxu0 %vm247_vm0, %v241_v5  ;;  %444 = vmatpush.msk.msra.mxu1 %vm247_vm0, %v242_v6 }
  0x19   : > { %443 = vmatmul.msk.f32.vlgmr.msra.gmra.mxu0 %vm243_vm1, %v238_v4  ;;  %445 = vmatmul.msk.f32.vlgmr.msra.gmra.mxu1 %vm243_vm1, %v238_v4 }
  0x80   : > { %v296_v7 = vpop.permute.xlu0 %295 }
  0x88   : > { %v304_v12 = vpop.permute.xlu0 %303 }
  0x96   : > { %v269_v8 = vpop.f32.mrf.mxu0  ;;  %v289_v9 = vpop.f32.mrf.mxu1 }
  0x97   : > { %v298_v10 = vmul.f32 %v296_v7, %v269_v8  ;;  %v299_v11 = vmul.f32 %v296_v7, %v289_v9 }
  0x99   : > { %v306_v13 = vadd.f32 %v304_v12, %v298_v10  ;;  %v307_v14 = vadd.f32 %v304_v12, %v299_v11 }
  0x9b   : > { %v308_v15 = vsub.f32 0.0, %v306_v13  ;;  %v309_v16 = vsub.f32 0.0, %v307_v14 }
  0x9d   : > { %v310_v17 = vmul.f32 1.442695, %v308_v15  ;;  %v312_v18 = vmul.f32 1.442695, %v309_v16 }
  0x9f   : > { %476 = vpow2.f32 %v310_v17 }
  0xa0   : > { %478 = vpow2.f32 %v312_v18 }
  0xa5   : > { %v477_v19 = vpop.eup %476 }
  0xa6   : > { %v479_v20 = vpop.eup %478  ;;  %v314_v21 = vadd.f32 1.0, %v477_v19 }
  0xa7   : > { %v315_v22 = vadd.f32 1.0, %v479_v20 }
  0xa8   : > { %480 = vrcp.f32 %v314_v21  ;;  %v327_v28 = vand.u32 2147483648, %v314_v21  ;;  %v325_v31 = vand.u32 2147483647, %v314_v21  ;;  %vm321_vm4 = vweird.f32 %v314_v21 }
  0xa9   : > { %482 = vrcp.f32 %v315_v22  ;;  %v341_v32 = vand.u32 2147483648, %v315_v22  ;;  %v339_v34 = vand.u32 2147483647, %v315_v22  ;;  %vm335_vm6 = vweird.f32 %v315_v22 }
  0xaa   : > { %v328_v36 = vor.u32 1.1754944e-38, %v327_v28  ;;  %vm326_vm7 = vcmp.eq.f32.partialorder %v325_v31, 8.507059e+37 }
  0xab   : > { %v342_v39 = vor.u32 1.1754944e-38, %v341_v32  ;;  %vm340_vm9 = vcmp.eq.f32.partialorder %v339_v34, 8.507059e+37 }
  0xae   : > { %v481_v23 = vpop.eup %480 }
  0xaf   : > { %v483_v24 = vpop.eup %482  ;;  %v317_v25 = vmul.f32 %v481_v23, %v314_v21  ;;  %vm322_vm2 = vweird.f32 %v481_v23 }
  0xb0   : > { %v331_v26 = vmul.f32 %v483_v24, %v315_v22  ;;  %vm336_vm3 = vweird.f32 %v483_v24  ;;  %vm323_vm5 = vmor %vm321_vm4, %vm322_vm2 }
  0xb1   : > { %v318_v27 = vsub.f32 1.0, %v317_v25  ;;  %vm337_vm8 = vmor %vm335_vm6, %vm336_vm3 }
  0xb2   : > { %v332_v29 = vsub.f32 1.0, %v331_v26 }
  0xb3   : > { %v319_v30 = vmul.f32 %v481_v23, %v318_v27 }
  0xb4   : > { %v333_v33 = vmul.f32 %v483_v24, %v332_v29 }
  0xb5   : > { %v320_v35 = vadd.f32 %v481_v23, %v319_v30 }
  0xb6   : > { %v334_v37 = vadd.f32 %v483_v24, %v333_v33 }
  0xb7   : > { %v324_v38 = vsel %vm323_vm5, %v481_v23, %v320_v35 }
  0xb8   : > { %v329_v40 = vsel %vm326_vm7, %v328_v36, %v324_v38  ;;  %v338_v41 = vsel %vm337_vm8, %v483_v24, %v334_v37 }
  0xb9   : > { %344 = vst [vmem:[%s235_s6] sm:$0xff] %v329_v40  ;;  %v343_v42 = vsel %vm340_vm9, %v342_v39, %v338_v41 }
  0xba   : > { %345 = vst [vmem:[%s235_s6 + $0x8] sm:$0xff] %v343_v42 }
  0xbb PF: > { %s14_s17 = sadd.s32 1, %s506_s17   ;;  %s585_s15 = smov %s502_s16 }
  0xbc   : > { %p11_p5 = scmp.ge.s32.totalorder %s14_s17, 4   ;;  %s586_s16 = smov %s588_s18 }
  0xbe   :  { %13 = sbr.rel (!%p11_p5) target bundleno = 2 (0x2), region = 66 }

</bundles_post_ra>
